<compile_context>
chip_gen: v5e
topology: v5e:2x2
jax: 0.10.0
libtpu: 0.0.40
codegen_flags: <defaults>
</compile_context>

<pallas_src>
import functools

import jax
import jax.numpy as jnp
from jax.experimental import pallas as pl
from jax.experimental.pallas import tpu as pltpu


def _round_up(x, m):
    return ((x + m - 1) // m) * m


def _focal_loss_kernel(logits_ref, targets_ref, alpha_ref, *out_refs,
                       gamma, ignore_index, reduction, batch, tile_rows):
    i = pl.program_id(0)
    logits = logits_ref[...].astype(jnp.float32)      # (TB, C) native->f32 in VMEM
    t = targets_ref[...]                              # (TB, 1) int32
    alpha = alpha_ref[...].astype(jnp.float32)        # (1, C)
    TB, C = logits.shape

    # --- log-softmax statistics over the class (lane) axis.
    #     The full (TB, C) log-prob array is never materialized. ---
    m = jnp.max(logits, axis=-1, keepdims=True)                       # (TB, 1)
    shifted = logits - m                                              # (TB, C)
    lse = jnp.log(jnp.sum(jnp.exp(shifted), axis=-1, keepdims=True))  # (TB, 1)

    # --- gather at target index via masked lane reductions (no dynamic gather) ---
    col = jax.lax.broadcasted_iota(jnp.int32, (TB, C), 1)
    onehot = col == t                                                 # (TB, C)
    shifted_t = jnp.sum(jnp.where(onehot, shifted, 0.0), axis=-1, keepdims=True)
    at = jnp.sum(jnp.where(onehot, alpha, 0.0), axis=-1, keepdims=True)

    logpt = shifted_t - lse                                           # (TB, 1)
    pt = jnp.exp(logpt)
    one_m_pt = 1.0 - pt

    g = float(gamma)
    if g == 0.0:
        focal = jnp.ones_like(one_m_pt)
    elif g == int(g) and 1.0 <= g <= 4.0:
        # integer gamma (e.g. the common gamma=2): plain VALU multiplies
        focal = one_m_pt
        for _ in range(int(g) - 1):
            focal = focal * one_m_pt
    else:
        focal = jnp.power(one_m_pt, g)

    loss = -at * focal * logpt                                        # (TB, 1)

    # --- mask batch padding (and ignore_index rows) ---
    row = jax.lax.broadcasted_iota(jnp.int32, (TB, 1), 0) + i * tile_rows
    valid = row < batch
    if ignore_index is not None:
        valid = valid & (t != ignore_index)
    loss = jnp.where(valid, loss, 0.0)

    if reduction == "none":
        out_refs[0][...] = loss
    else:
        psum = jnp.sum(loss)
        cnt = jnp.sum(valid.astype(jnp.float32))
        # lane-dense (8, 128) partials slab per tile; wrapper reduces.
        out_refs[0][...] = jnp.full((8, 128), psum, jnp.float32)
        out_refs[1][...] = jnp.full((8, 128), cnt, jnp.float32)


def focal_loss(logits, targets, alpha=None, gamma=2.0, reduction="mean",
               ignore_index=None, tile_rows=None):
    """logits: (B, C) float (any dtype), targets: (B,) int — FocalLoss.forward."""
    if logits.ndim != 2:
        raise ValueError("Expecting 2-D logits (B,C)")
    B, C = logits.shape

    # per-class alpha row (scalar alpha broadcasts identically to PyTorch)
    if alpha is None:
        alpha_vec = jnp.ones((1, C), jnp.float32)
    else:
        alpha_arr = jnp.asarray(alpha, jnp.float32)
        alpha_vec = (jnp.full((1, C), alpha_arr, jnp.float32)
                     if alpha_arr.ndim == 0 else alpha_arr.reshape(1, C))

    itemsize = jnp.dtype(logits.dtype).itemsize
    if tile_rows is None:
        # biggest multiple-of-128 batch tile whose double-buffered logits slab
        # fits a conservative VMEM budget valid on v5e/v6e/v7x.
        budget = 6 * 1024 * 1024
        tb = max(128, (budget // (2 * C * itemsize)) // 128 * 128)
        tile_rows = int(min(tb, 1024, _round_up(B, 128)))
    TB = int(tile_rows)
    B_pad = _round_up(B, TB)
    num_tiles = B_pad // TB

    # pad batch to a whole number of tiles; padded rows are masked in-kernel
    logits_p = logits if B_pad == B else jnp.pad(logits, ((0, B_pad - B), (0, 0)))
    t32 = targets.astype(jnp.int32).reshape(B, 1)
    targets_p = t32 if B_pad == B else jnp.pad(t32, ((0, B_pad - B), (0, 0)))

    kernel = functools.partial(
        _focal_loss_kernel, gamma=float(gamma), ignore_index=ignore_index,
        reduction=reduction, batch=B, tile_rows=TB)

    in_specs = [
        pl.BlockSpec((TB, C), lambda i: (i, 0)),   # logits, native dtype
        pl.BlockSpec((TB, 1), lambda i: (i, 0)),   # targets column
        pl.BlockSpec((1, C), lambda i: (0, 0)),    # per-class alpha row
    ]

    if reduction == "none":
        out_shape = jax.ShapeDtypeStruct((B_pad, 1), jnp.float32)
        out_specs = pl.BlockSpec((TB, 1), lambda i: (i, 0))
    else:
        out_shape = (jax.ShapeDtypeStruct((8, 128 * num_tiles), jnp.float32),
                     jax.ShapeDtypeStruct((8, 128 * num_tiles), jnp.float32))
        out_specs = (pl.BlockSpec((8, 128), lambda i: (0, i)),
                     pl.BlockSpec((8, 128), lambda i: (0, i)))

    out = pl.pallas_call(
        kernel,
        out_shape=out_shape,
        grid=(num_tiles,),
        in_specs=in_specs,
        out_specs=out_specs,
        compiler_params=pltpu.CompilerParams(
            dimension_semantics=("parallel",),
            vmem_limit_bytes=32 * 1024 * 1024),
    )(logits_p, targets_p, alpha_vec)

    if reduction == "none":
        # TODO(synk): with ignore_index, PyTorch drops ignored rows (dynamic
        # shape); here they are returned as 0.0 at full length B.
        return out[:B, 0]

    sums, cnts = out
    total = jnp.sum(sums[0, ::128])
    count = jnp.sum(cnts[0, ::128])
    if reduction == "sum":
        return total
    # mean; PyTorch returns 0.0 when every row is ignored
    return jnp.where(count > 0, total / jnp.maximum(count, 1.0), jnp.float32(0.0))


def _focal_loss_ref(logits, targets, alpha, gamma, reduction, ignore_index):
    """Pure-JAX reference mirroring FocalLoss.forward (zeros kept for 'none')."""
    C = logits.shape[1]
    logits = logits.astype(jnp.float32)
    if alpha is None:
        alpha_vec = jnp.ones((C,), jnp.float32)
    else:
        a = jnp.asarray(alpha, jnp.float32)
        alpha_vec = jnp.full((C,), a, jnp.float32) if a.ndim == 0 else a
    t = targets.astype(jnp.int32)
    safe_t = jnp.clip(t, 0, C - 1)
    logp = jax.nn.log_softmax(logits, axis=-1)
    logpt = jnp.take_along_axis(logp, safe_t[:, None], axis=1)[:, 0]
    pt = jnp.exp(logpt)
    at = alpha_vec[safe_t]
    loss = -at * (1.0 - pt) ** gamma * logpt
    valid = jnp.ones_like(t, bool) if ignore_index is None else (t != ignore_index)
    loss = jnp.where(valid, loss, 0.0)
    if reduction == "sum":
        return jnp.sum(loss)
    if reduction == "mean":
        cnt = jnp.sum(valid.astype(jnp.float32))
        return jnp.where(cnt > 0, jnp.sum(loss) / jnp.maximum(cnt, 1.0), 0.0)
    return loss


if __name__ == "__main__":
    B, C = 8, 32
    key = jax.random.PRNGKey(0)
    k_logits, k_targets, k2 = jax.random.split(key, 3)

    logits = jax.random.normal(k_logits, (B, C), dtype=jnp.float32)
    targets = jax.random.randint(k_targets, (B,), 0, C, dtype=jnp.int32)

    # Deterministic class-balanced alpha (Cui et al. 2019 style).
    counts = jnp.arange(1, C + 1, dtype=jnp.float32) * 10.0
    beta = 0.999
    alpha = (1.0 - beta) / (1.0 - jnp.power(beta, counts))   # (C,)

    # mean reduction
    loss = jax.block_until_ready(
        focal_loss(logits, targets, alpha=alpha, gamma=2.0, reduction="mean"))
    ref = _focal_loss_ref(logits, targets, alpha, 2.0, "mean", None)
    assert jnp.allclose(loss, ref, atol=1e-5, rtol=1e-5), (loss, ref)

    # sum reduction
    s = jax.block_until_ready(
        focal_loss(logits, targets, alpha=alpha, gamma=2.0, reduction="sum"))
    sref = _focal_loss_ref(logits, targets, alpha, 2.0, "sum", None)
    assert jnp.allclose(s, sref, atol=1e-5, rtol=1e-5), (s, sref)

    # 'none' reduction, non-integer gamma, scalar alpha
    n = jax.block_until_ready(
        focal_loss(logits, targets, alpha=None, gamma=1.5, reduction="none"))
    nref = _focal_loss_ref(logits, targets, None, 1.5, "none", None)
    assert n.shape == (B,)
    assert jnp.allclose(n, nref, atol=1e-5, rtol=1e-5), (n, nref)

    # ignore_index masking (mean)
    ig = int(targets[0])
    li = jax.block_until_ready(
        focal_loss(logits, targets, alpha=alpha, gamma=2.0, reduction="mean",
                   ignore_index=ig))
    liref = _focal_loss_ref(logits, targets, alpha, 2.0, "mean", ig)
    assert jnp.allclose(li, liref, atol=1e-5, rtol=1e-5), (li, liref)

    # multi-tile + padded batch + bf16 logits (native-dtype DMA path)
    B2, C2 = 260, 48
    kl2, kt2 = jax.random.split(k2)
    logits2 = jax.random.normal(kl2, (B2, C2), dtype=jnp.float32).astype(jnp.bfloat16)
    targets2 = jax.random.randint(kt2, (B2,), 0, C2, dtype=jnp.int32)
    l2 = jax.block_until_ready(
        focal_loss(logits2, targets2, alpha=0.25, gamma=2.0, reduction="mean",
                   tile_rows=128))
    l2ref = _focal_loss_ref(logits2, targets2, 0.25, 2.0, "mean", None)
    assert jnp.allclose(l2, l2ref, atol=1e-5, rtol=1e-5), (l2, l2ref)

    print("KERNEL_OK")
</pallas_src>

<mosaic_0001>
module attributes {stable_mosaic.version = 11 : i64} {
  func.func @_focal_loss_kernel(%arg0: i32, %arg1: memref<128x32xf32, #tpu.memory_space<vmem>>, %arg2: memref<128x1xi32, #tpu.memory_space<vmem>>, %arg3: memref<1x32xf32, #tpu.memory_space<vmem>>, %arg4: memref<8x128xf32, #tpu.memory_space<vmem>>, %arg5: memref<8x128xf32, #tpu.memory_space<vmem>>) attributes {dimension_semantics = [#tpu.dimension_semantics<parallel>], iteration_bounds = array<i64: 1>, scalar_prefetch = 0 : i64, scratch_operands = 0 : i64, tpu.core_type = #tpu.core_type<tc>, window_params = [{transform_indices = @transform_0, window_bounds = array<i64: 128, 32>}, {transform_indices = @transform_1, window_bounds = array<i64: 128, 1>}, {pipeline_mode = #tpu.pipeline_mode<synchronous>, transform_indices = @transform_2, window_bounds = array<i64: 1, 32>}, {transform_indices = @transform_3, window_bounds = array<i64: 8, 128>}, {transform_indices = @transform_4, window_bounds = array<i64: 8, 128>}]} {
    %c0 = arith.constant 0 : index
    %c0_0 = arith.constant 0 : index
    %0 = vector.load %arg1[%c0, %c0_0] : memref<128x32xf32, #tpu.memory_space<vmem>>, vector<128x32xf32>
    %c0_1 = arith.constant 0 : index
    %c0_2 = arith.constant 0 : index
    %1 = vector.load %arg2[%c0_1, %c0_2] : memref<128x1xi32, #tpu.memory_space<vmem>>, vector<128x1xi32>
    %c0_3 = arith.constant 0 : index
    %c0_4 = arith.constant 0 : index
    %2 = vector.load %arg3[%c0_3, %c0_4] : memref<1x32xf32, #tpu.memory_space<vmem>>, vector<1x32xf32>
    %cst = arith.constant dense<0xFF800000> : vector<128xf32>
    %3 = vector.multi_reduction <maximumf>, %0, %cst [1] : vector<128x32xf32> to vector<128xf32>
    %4 = vector.shape_cast %3 : vector<128xf32> to vector<128x1xf32>
    %5 = vector.broadcast %4 : vector<128x1xf32> to vector<128x32xf32>
    %6 = arith.subf %0, %5 : vector<128x32xf32>
    %7 = math.exp %6 : vector<128x32xf32>
    %cst_5 = arith.constant dense<0.000000e+00> : vector<128xf32>
    %8 = vector.multi_reduction <add>, %7, %cst_5 [1] : vector<128x32xf32> to vector<128xf32>
    %9 = vector.shape_cast %8 : vector<128xf32> to vector<128x1xf32>
    %10 = math.log %9 : vector<128x1xf32>
    %11 = tpu.iota {dimensions = array<i32: 1>} : vector<128x32xi32>
    %12 = vector.broadcast %1 : vector<128x1xi32> to vector<128x32xi32>
    %13 = arith.cmpi eq, %11, %12 : vector<128x32xi32>
    %cst_6 = arith.constant 0.000000e+00 : f32
    %14 = vector.broadcast %cst_6 : f32 to vector<128x32xf32>
    %15 = arith.select %13, %6, %14 : vector<128x32xi1>, vector<128x32xf32>
    %cst_7 = arith.constant dense<0.000000e+00> : vector<128xf32>
    %16 = vector.multi_reduction <add>, %15, %cst_7 [1] : vector<128x32xf32> to vector<128xf32>
    %17 = vector.shape_cast %16 : vector<128xf32> to vector<128x1xf32>
    %cst_8 = arith.constant 0.000000e+00 : f32
    %18 = vector.shape_cast %2 : vector<1x32xf32> to vector<1x32xf32>
    %19 = vector.broadcast %18 : vector<1x32xf32> to vector<128x32xf32>
    %20 = vector.broadcast %cst_8 : f32 to vector<128x32xf32>
    %21 = arith.select %13, %19, %20 : vector<128x32xi1>, vector<128x32xf32>
    %cst_9 = arith.constant dense<0.000000e+00> : vector<128xf32>
    %22 = vector.multi_reduction <add>, %21, %cst_9 [1] : vector<128x32xf32> to vector<128xf32>
    %23 = vector.shape_cast %22 : vector<128xf32> to vector<128x1xf32>
    %24 = arith.subf %17, %10 : vector<128x1xf32>
    %25 = math.exp %24 : vector<128x1xf32>
    %cst_10 = arith.constant 1.000000e+00 : f32
    %26 = vector.broadcast %cst_10 : f32 to vector<128x1xf32>
    %27 = arith.subf %26, %25 : vector<128x1xf32>
    %28 = arith.mulf %27, %27 : vector<128x1xf32>
    %cst_11 = arith.constant 0.000000e+00 : f32
    %29 = vector.broadcast %cst_11 : f32 to vector<128x1xf32>
    %30 = arith.subf %29, %23 : vector<128x1xf32>
    %31 = arith.mulf %30, %28 : vector<128x1xf32>
    %32 = arith.mulf %31, %24 : vector<128x1xf32>
    %33 = tpu.iota {dimensions = array<i32: 0>} : vector<128x1xi32>
    %c128_i32 = arith.constant 128 : i32
    %34 = arith.muli %arg0, %c128_i32 : i32
    %35 = vector.broadcast %34 : i32 to vector<128x1xi32>
    %36 = arith.addi %33, %35 : vector<128x1xi32>
    %c8_i32 = arith.constant 8 : i32
    %37 = vector.broadcast %c8_i32 : i32 to vector<128x1xi32>
    %38 = arith.cmpi slt, %36, %37 : vector<128x1xi32>
    %cst_12 = arith.constant 0.000000e+00 : f32
    %39 = vector.broadcast %cst_12 : f32 to vector<128x1xf32>
    %40 = arith.select %38, %32, %39 : vector<128x1xi1>, vector<128x1xf32>
    %41 = vector.shape_cast %40 : vector<128x1xf32> to vector<1x128x1xf32>
    %cst_13 = arith.constant dense<0.000000e+00> : vector<1xf32>
    %42 = vector.multi_reduction <add>, %41, %cst_13 [1, 2] : vector<1x128x1xf32> to vector<1xf32>
    %43 = vector.shape_cast %42 : vector<1xf32> to vector<1x1x1xf32>
    %44 = vector.extract %43[0, 0, 0] : f32 from vector<1x1x1xf32>
    %45 = arith.extui %38 : vector<128x1xi1> to vector<128x1xi32>
    %46 = arith.sitofp %45 : vector<128x1xi32> to vector<128x1xf32>
    %47 = vector.shape_cast %46 : vector<128x1xf32> to vector<1x128x1xf32>
    %cst_14 = arith.constant dense<0.000000e+00> : vector<1xf32>
    %48 = vector.multi_reduction <add>, %47, %cst_14 [1, 2] : vector<1x128x1xf32> to vector<1xf32>
    %49 = vector.shape_cast %48 : vector<1xf32> to vector<1x1x1xf32>
    %50 = vector.extract %49[0, 0, 0] : f32 from vector<1x1x1xf32>
    %51 = vector.broadcast %44 : f32 to vector<8x128xf32>
    %c0_15 = arith.constant 0 : index
    %c0_16 = arith.constant 0 : index
    %52 = vector.load %arg4[%c0_15, %c0_16] : memref<8x128xf32, #tpu.memory_space<vmem>>, vector<8x128xf32>
    tpu.vector_store %arg4[%c0_15, %c0_16], %51 {strides = array<i32>} : memref<8x128xf32, #tpu.memory_space<vmem>>, vector<8x128xf32>,
    %53 = vector.broadcast %50 : f32 to vector<8x128xf32>
    %c0_17 = arith.constant 0 : index
    %c0_18 = arith.constant 0 : index
    %54 = vector.load %arg5[%c0_17, %c0_18] : memref<8x128xf32, #tpu.memory_space<vmem>>, vector<8x128xf32>
    tpu.vector_store %arg5[%c0_17, %c0_18], %53 {strides = array<i32>} : memref<8x128xf32, #tpu.memory_space<vmem>>, vector<8x128xf32>,
    return
  }
  func.func @transform_0(%arg0: i32) -> (i32, i32) {
    %c0_i32 = arith.constant 0 : i32
    %c0_i32_0 = arith.constant 0 : i32
    return %arg0, %c0_i32 : i32, i32
  }
  func.func @transform_1(%arg0: i32) -> (i32, i32) {
    %c0_i32 = arith.constant 0 : i32
    %c0_i32_0 = arith.constant 0 : i32
    return %arg0, %c0_i32 : i32, i32
  }
  func.func @transform_2(%arg0: i32) -> (i32, i32) {
    %c0_i32 = arith.constant 0 : i32
    %c0_i32_0 = arith.constant 0 : i32
    %c0_i32_1 = arith.constant 0 : i32
    return %c0_i32, %c0_i32_0 : i32, i32
  }
  func.func @transform_3(%arg0: i32) -> (i32, i32) {
    %c0_i32 = arith.constant 0 : i32
    %c0_i32_0 = arith.constant 0 : i32
    return %c0_i32, %arg0 : i32, i32
  }
  func.func @transform_4(%arg0: i32) -> (i32, i32) {
    %c0_i32 = arith.constant 0 : i32
    %c0_i32_0 = arith.constant 0 : i32
    return %c0_i32, %arg0 : i32, i32
  }
}

</mosaic_0001>

<bundles_post_ra>
// kernel: tpu_custom_call.1
= control target key start
LH: loop header
LB: loop body
LE: loop exit
PB: predicated region body
PF: predicated region fallthrough
CT: control target
= control target key end

     0   :  { %10 = vsyncpa [#allocation3], 0  ;;  %vm51_vm0 = vcmask 261120   ;;  %v837_v2 = vmov 0   ;;  %s887_s0 = inlined_call_operand.vmem [shape: f32[128,32], index: 0, kind: input, shape index: {}]   ;;  %s888_s1 = inlined_call_operand.vmem [shape: s32[128,1], index: 1, kind: input, shape index: {}]   ;;  %s889_s2 = inlined_call_operand.vmem [shape: f32[1,32], index: 2, kind: input, shape index: {}]   ;;  %s890_s3 = inlined_call_operand.hbm [shape: f32[8,128], index: 3, kind: output, shape index: {0}]   ;;  %s891_s4 = inlined_call_operand.hbm [shape: f32[8,128], index: 4, kind: output, shape index: {1}]  }
   0x1   :  { %v18_v0 = vld [vmem:[%s887_s0] sm:$0xff]  ;;  %777 = vset.pattern.permute.xlu0 %v837_v2 }
   0x2   :  { %v52_v1 = vsel %vm51_vm0, %v18_v0, -inf }
   0x3   :  { %11 = vsyncpa [#allocation5], 0  ;;  %53 = vmax.xlane.f32.xlu0 %v52_v1  ;;  %v34_v3 = vld [vmem:[%s888_s1] sm:$0xff]  ;;  %v228_v9 = vlaneseq  ;;  %vm620_vm2 = vcmask 7168   ;;  %v838_v17 = vmov 0.0   ;;  %s839_s1 = smov [#allocation2]  }
   0x4   :  { %v778_v11 = vld [vmem:[%s889_s2] ss:$0 sm:$0xff]  ;;  %v693_v18 = vsel %vm620_vm2, 1.0, %v838_v17  ;;  %s742_s2 = sshll.u32 %s839_s1, 4  ;;  %s744_s22 = sshll.u32 %s890_s3, 4  ;;  %s743_s2 = int_to_ptr.vmem [resolvable:$true] %s742_s2  ;;  %s745_s22 = int_to_ptr.hbm [resolvable:$true] %s744_s22 }
   0x5   :  { %v229_v10 = vand.u32 127, %v228_v9  ;;  %s840_s23 = smov [#allocation4]   ;;  %s755_s27 = sshll.u32 %s891_s4, 4  ;;  %s756_s27 = int_to_ptr.hbm [resolvable:$true] %s755_s27 }
   0x6   :  { %s753_s24 = sshll.u32 %s840_s23, 4  ;;  %s754_s24 = int_to_ptr.vmem [resolvable:$true] %s753_s24 }
  0x17   :  { %231 = vperm.xlu0 %777, %v34_v3  }
  0x76   :  { %v54_v4 = vpop.xlane.xlu0 %53 }
  0x77   :  { %v100_v5 = vsub.f32 %v18_v0, %v54_v4 }
  0x79   :  { %v116_v6 = vmul.f32 1.442695, %v100_v5 }
  0x7b   :  { %779 = vpow2.f32 %v116_v6 }
  0x81   :  { %v780_v7 = vpop.eup %779 }
  0x82   :  { %v148_v8 = vsel %vm51_vm0, %v780_v7, 0.0 }
  0x83   :  { %149 = vadd.xlane.f32.xlu1 %v148_v8 }
  0x89   :  { %v232_v12 = vpop.permute.xlu0 %231 }
  0x8a   :  { %vm278_vm1 = vcmp.eq.s32.totalorder %v229_v10, %v232_v12 }
  0x8b   :  { %v361_v13 = vsel %vm278_vm1, %v778_v11, 0.0  ;;  %v294_v14 = vsel %vm278_vm1, %v100_v5, 0.0 }
  0x8c   :  { %v377_v15 = vsel %vm51_vm0, %v361_v13, 0.0  ;;  %v310_v16 = vsel %vm51_vm0, %v294_v14, 0.0 }
  0x8d   :  { %378 = vadd.xlane.f32.xlu2 %v377_v15  ;;  %311 = vadd.xlane.f32.xlu1 %v310_v16 }
  0x95   :  { %724 = vadd.xlane.f32.xlu1 %v693_v18 }
  0xf6   :  { %v150_v19 = vpop.xlane.xlu1 %149 }
  0xf7   :  { %781 = vlog2.f32 %v150_v19 }
  0xfd   :  { %v782_v20 = vpop.eup %781 }
  0xfe   :  { %v197_v21 = vmul.f32 0.6931472, %v782_v20 }
 0x100   :  { %v312_v22 = vpop.xlane.xlu1 %311  ;;  %v379_v26 = vpop.xlane.xlu2 %378 }
 0x101   :  { %v425_v23 = vsub.f32 %v312_v22, %v197_v21  ;;  %v505_v28 = vsub.f32 0.0, %v379_v26 }
 0x103   :  { %v441_v24 = vmul.f32 1.442695, %v425_v23 }
 0x105   :  { %783 = vpow2.f32 %v441_v24 }
 0x108   :  { %v725_v33 = vpop.xlane.xlu1 %724 }
 0x109   :  { %v726_v34 = vrot.slane %v725_v33, 4 }
 0x10b   :  { %v784_v25 = vpop.eup %783  ;;  %v727_v35 = vadd.f32 %v726_v34, %v725_v33 }
 0x10c   :  { %v473_v27 = vsub.f32 1.0, %v784_v25 }
 0x10d   :  { %v728_v36 = vrot.slane %v727_v35, 2 }
 0x10e   :  { %v489_v29 = vmul.f32 %v473_v27, %v473_v27 }
 0x10f   :  { %v729_v40 = vadd.f32 %v728_v36, %v727_v35 }
 0x110   :  { %v521_v30 = vmul.f32 %v505_v28, %v489_v29 }
 0x111   :  { %v730_v43 = vrot.slane %v729_v40, 1 }
 0x112   :  { %v537_v31 = vmul.f32 %v521_v30, %v425_v23 }
 0x113   :  { %v731_v46 = vadd.f32 %v730_v43, %v729_v40 }
 0x114   :  { %v621_v32 = vsel %vm620_vm2, %v537_v31, 0.0 }
 0x115   :  { %652 = vadd.xlane.f32.xlu2 %v621_v32 }
 0x188   :  { %v653_v37 = vpop.xlane.xlu2 %652 }
 0x189   :  { %v654_v38 = vrot.slane %v653_v37, 4 }
 0x18b   :  { %v655_v39 = vadd.f32 %v654_v38, %v653_v37 }
 0x18d   :  { %v656_v41 = vrot.slane %v655_v39, 2 }
 0x18f   :  { %v657_v42 = vadd.f32 %v656_v41, %v655_v39 }
 0x191   :  { %v658_v44 = vrot.slane %v657_v42, 1 }
 0x193   :  { %v659_v45 = vadd.f32 %v658_v44, %v657_v42 }
 0x195   :  { %769 = vpush %v659_v45 }
 0x196   :  { %771 = vpush %v731_v46 }
 0x1c6   :  { %s770_s28 = spop %769 }
 0x1c7   :  { %v733_v47 = vstv %s770_s28  ;;  %s772_s29 = spop %771 }
 0x1c8   :  { %734 = vst [vmem:[#allocation2] sm:$0xff] %v733_v47  ;;  %v735_v48 = vstv %s772_s29 }
 0x1c9   :  { %736 = vst [vmem:[#allocation4] sm:$0xff] %v735_v48  ;;  %747 = dma.vmem_to_hbm [thread:$0]  %s743_s2, 128, %s745_s22, [#allocation3]  }
 0x1ca   :  { %758 = dma.vmem_to_hbm [thread:$0]  %s754_s24, 128, %s756_s27, [#allocation5]  }
 0x1cb   :  { %833 = dma.done.wait [#allocation3], 128  }
 0x1cc   :  { %834 = vsyncadd [#allocation3], 4294967168 }
 0x1cd   :  { %835 = dma.done.wait [#allocation5], 128  }
 0x1ce   :  { %836 = vsyncadd [#allocation5], 4294967168 }
 0x1cf   :  { %767 = vsyncpa [#allocation3], 1 }
 0x1d0   :  { %768 = vsyncpa [#allocation5], 1 }

</bundles_post_ra>
